<compile_context>
chip_gen: v6e
topology: v6e:2x2x1
jax: 0.10.0
libtpu: 0.0.40
codegen_flags: <defaults>
</compile_context>

<pallas_src>
import functools

import jax
import jax.numpy as jnp
from jax.experimental import pallas as pl
from jax.experimental.pallas import tpu as pltpu


_VMEM = pl.BlockSpec(memory_space=pltpu.MemorySpace.VMEM)


# -----------------------------------------------------------------------------
# Single-step kernels (exact MushroomAgent.forward semantics).
# -----------------------------------------------------------------------------
def _step_kernel_with_state(x_ref, h_ref,
                            w1x_ref, w1h_ref, b1_ref,
                            w2_ref, b2_ref,
                            wh_ref, bh_ref,
                            out_ref):
    x = x_ref[...].astype(jnp.bfloat16)
    h = h_ref[...].astype(jnp.bfloat16)

    # fc1 (split weight: x part + hidden part) + relu, f32 accumulate/epilogue
    a = jnp.dot(x, w1x_ref[...], preferred_element_type=jnp.float32)
    a = a + jnp.dot(h, w1h_ref[...], preferred_element_type=jnp.float32)
    a = jnp.maximum(a + b1_ref[...], 0.0)                      # (B, H) f32

    # fc2 + relu
    a = jnp.dot(a.astype(jnp.bfloat16), w2_ref[...],
                preferred_element_type=jnp.float32)
    a = jnp.maximum(a + b2_ref[...], 0.0)                      # (B, H) f32

    # fused heads (state_decoder | fc3), lane-dense padded output
    y = jnp.dot(a.astype(jnp.bfloat16), wh_ref[...],
                preferred_element_type=jnp.float32)
    out_ref[...] = (y + bh_ref[...]).astype(out_ref.dtype)     # (B, 128)


def _step_kernel_no_state(x_ref,
                          w1x_ref, b1_ref,
                          w2_ref, b2_ref,
                          wh_ref, bh_ref,
                          out_ref):
    # Hidden state is zeros -> its matmul contribution is exactly zero; skip it.
    x = x_ref[...].astype(jnp.bfloat16)

    a = jnp.dot(x, w1x_ref[...], preferred_element_type=jnp.float32)
    a = jnp.maximum(a + b1_ref[...], 0.0)

    a = jnp.dot(a.astype(jnp.bfloat16), w2_ref[...],
                preferred_element_type=jnp.float32)
    a = jnp.maximum(a + b2_ref[...], 0.0)

    y = jnp.dot(a.astype(jnp.bfloat16), wh_ref[...],
                preferred_element_type=jnp.float32)
    out_ref[...] = (y + bh_ref[...]).astype(out_ref.dtype)


def mushroom_agent_forward(x, kparams, hidden_state=None):
    """Single-step MushroomAgent.forward (module semantics).

    x: (B, input_size) f32;  hidden_state: (B, state_size) f32 or None.
    Returns (fc3_out (B, output_size), state_out (B, state_size)).
    """
    B = x.shape[0]
    O = kparams["output_size"]
    S = kparams["state_size"]
    head_pad = kparams["b_head"].shape[1]
    out_shape = jax.ShapeDtypeStruct((B, head_pad), jnp.float32)

    if hidden_state is None:
        y = pl.pallas_call(
            _step_kernel_no_state,
            out_shape=out_shape,
            in_specs=[_VMEM] * 7,
            out_specs=_VMEM,
        )(x,
          kparams["w1x"], kparams["b1"],
          kparams["w2"], kparams["b2"],
          kparams["w_head"], kparams["b_head"])
    else:
        y = pl.pallas_call(
            _step_kernel_with_state,
            out_shape=out_shape,
            in_specs=[_VMEM] * 9,
            out_specs=_VMEM,
        )(x, hidden_state,
          kparams["w1x"], kparams["w1h"], kparams["b1"],
          kparams["w2"], kparams["b2"],
          kparams["w_head"], kparams["b_head"])

    # Fused head layout: [state_decoder | fc3 | zero pad].
    return y[:, S:S + O], y[:, :S]


# -----------------------------------------------------------------------------
# Recurrent rollout: T forward steps in ONE pallas_call (grid over T),
# weights pinned VMEM-resident, hidden state carried in VMEM scratch.
# Step t uses hidden_state = state_decoder output of step t-1.
# -----------------------------------------------------------------------------
def _rollout_kernel(x_ref, h0_ref,
                    w1x_ref, w1h_ref, b1_ref,
                    w2_ref, b2_ref,
                    wh_ref, bh_ref,
                    out_ref,
                    h_scratch, *, state_size):
    t = pl.program_id(0)

    @pl.when(t == 0)
    def _():
        h_scratch[...] = h0_ref[...]

    x = x_ref[...].astype(jnp.bfloat16)                 # (B, I)
    h = h_scratch[...].astype(jnp.bfloat16)             # (B, S)

    a = jnp.dot(x, w1x_ref[...], preferred_element_type=jnp.float32)
    a = a + jnp.dot(h, w1h_ref[...], preferred_element_type=jnp.float32)
    a = jnp.maximum(a + b1_ref[...], 0.0)               # (B, H) f32

    a = jnp.dot(a.astype(jnp.bfloat16), w2_ref[...],
                preferred_element_type=jnp.float32)
    a = jnp.maximum(a + b2_ref[...], 0.0)                # (B, H) f32

    y = jnp.dot(a.astype(jnp.bfloat16), wh_ref[...],
                preferred_element_type=jnp.float32)
    y = y + bh_ref[...]                                   # (B, 128) f32

    out_ref[...] = y.astype(out_ref.dtype)               # full lane-dense slab
    # Feed the state head (lanes [0, S), lane-aligned) back on-chip.
    h_scratch[...] = y[:, :state_size]


def mushroom_agent_rollout(xs, kparams, hidden_state=None):
    """Run T recurrent forward steps in a single kernel.

    xs: (T, B, input_size) f32; hidden_state: (B, state_size) f32 or None.
    Returns (fc3_seq (T, B, output_size), state_seq (T, B, state_size)).
    """
    T, B, I = xs.shape
    O = kparams["output_size"]
    S = kparams["state_size"]
    head_pad = kparams["b_head"].shape[1]

    if hidden_state is None:
        hidden_state = jnp.zeros((B, S), jnp.float32)

    def pinned(arr):
        # Constant block index -> DMA'd once, stays VMEM-resident across steps.
        return pl.BlockSpec(arr.shape, lambda t: (0,) * arr.ndim)

    grid_spec = pltpu.PrefetchScalarGridSpec(
        num_scalar_prefetch=0,
        grid=(T,),
        in_specs=[
            pl.BlockSpec((None, B, I), lambda t: (t, 0, 0)),   # per-step x
            pinned(hidden_state),
            pinned(kparams["w1x"]), pinned(kparams["w1h"]), pinned(kparams["b1"]),
            pinned(kparams["w2"]), pinned(kparams["b2"]),
            pinned(kparams["w_head"]), pinned(kparams["b_head"]),
        ],
        out_specs=pl.BlockSpec((None, B, head_pad), lambda t: (t, 0, 0)),
        scratch_shapes=[pltpu.VMEM((B, S), jnp.float32)],      # carried state
    )

    y = pl.pallas_call(
        functools.partial(_rollout_kernel, state_size=S),
        out_shape=jax.ShapeDtypeStruct((T, B, head_pad), jnp.float32),
        grid_spec=grid_spec,
        compiler_params=pltpu.CompilerParams(
            dimension_semantics=("arbitrary",)),               # recurrence
    )(xs, hidden_state,
      kparams["w1x"], kparams["w1h"], kparams["b1"],
      kparams["w2"], kparams["b2"],
      kparams["w_head"], kparams["b_head"])

    return y[:, :, S:S + O], y[:, :, :S]


# -----------------------------------------------------------------------------
# Parameters.
# -----------------------------------------------------------------------------
def init_params(key, input_size, hidden_size, output_size, state_size):
    """PyTorch-style uniform(+-1/sqrt(fan_in)) init.  Weights stored as
    (in_features, out_features) — transposed vs. torch.  Biases (1, out)."""
    def linear(k, fan_in, fan_out):
        kw, kb = jax.random.split(k)
        bound = 1.0 / jnp.sqrt(float(fan_in))
        w = jax.random.uniform(kw, (fan_in, fan_out), jnp.float32, -bound, bound)
        b = jax.random.uniform(kb, (1, fan_out), jnp.float32, -bound, bound)
        return w, b

    k1, k2, k3, kd = jax.random.split(key, 4)
    w1, b1 = linear(k1, input_size + state_size, hidden_size)
    w2, b2 = linear(k2, hidden_size, hidden_size)
    w3, b3 = linear(k3, hidden_size, output_size)
    wd, bd = linear(kd, hidden_size, state_size)
    return dict(w1=w1, b1=b1, w2=w2, b2=b2, w3=w3, b3=b3, wd=wd, bd=bd)


def prepare_kernel_params(params, input_size):
    """One-time re-layout for the fused kernels:
       - split w1 into x-part / hidden-part,
       - fuse state_decoder | fc3 into one lane-dense (H, 128k) head
         (state lanes FIRST so the in-kernel recurrence slice is lane-aligned),
       - store matmul weights in bf16 (biases stay f32 for the f32 epilogue)."""
    H = params["w2"].shape[0]
    O = params["w3"].shape[1]
    S = params["wd"].shape[1]
    head_pad = max(128, ((S + O + 127) // 128) * 128)

    w_head = jnp.zeros((H, head_pad), jnp.float32)
    w_head = w_head.at[:, :S].set(params["wd"])
    w_head = w_head.at[:, S:S + O].set(params["w3"])
    b_head = jnp.zeros((1, head_pad), jnp.float32)
    b_head = b_head.at[:, :S].set(params["bd"])
    b_head = b_head.at[:, S:S + O].set(params["b3"])

    bf = jnp.bfloat16
    return dict(
        w1x=params["w1"][:input_size, :].astype(bf),
        w1h=params["w1"][input_size:, :].astype(bf),
        b1=params["b1"],
        w2=params["w2"].astype(bf), b2=params["b2"],
        w_head=w_head.astype(bf), b_head=b_head,
        output_size=O, state_size=S,
    )


# -----------------------------------------------------------------------------
# References.
# -----------------------------------------------------------------------------
def ref_step_f32(x, h, params):
    """Pure f32 reference mirroring the PyTorch module exactly."""
    xc = jnp.concatenate((x, h), axis=1)
    a = jnp.maximum(xc @ params["w1"] + params["b1"], 0.0)
    a = jnp.maximum(a @ params["w2"] + params["b2"], 0.0)
    return a @ params["w3"] + params["b3"], a @ params["wd"] + params["bd"]


def ref_step_bf16(x, h, kparams):
    """Reference emulating the kernel numerics (bf16 matmul inputs, f32 acc)."""
    mm = lambda a, w: jnp.dot(a.astype(jnp.bfloat16), w,
                              preferred_element_type=jnp.float32)
    a = jnp.maximum(mm(x, kparams["w1x"]) + mm(h, kparams["w1h"])
                    + kparams["b1"], 0.0)
    a = jnp.maximum(mm(a, kparams["w2"]) + kparams["b2"], 0.0)
    y = mm(a, kparams["w_head"]) + kparams["b_head"]
    S, O = kparams["state_size"], kparams["output_size"]
    return y[:, S:S + O], y[:, :S]


# -----------------------------------------------------------------------------
if __name__ == "__main__":
    input_size, hidden_size, output_size, state_size = 16, 32, 4, 8
    batch, seq = 2, 8

    key = jax.random.PRNGKey(0)
    k_params, k_x, k_h, k_seq = jax.random.split(key, 4)

    params = init_params(k_params, input_size, hidden_size, output_size, state_size)
    kparams = prepare_kernel_params(params, input_size)

    x = jax.random.normal(k_x, (batch, input_size), dtype=jnp.float32)
    h0 = jax.random.normal(k_h, (batch, state_size), dtype=jnp.float32)
    xs = jax.random.normal(k_seq, (seq, batch, input_size), dtype=jnp.float32)
    zeros_h = jnp.zeros((batch, state_size), jnp.float32)

    # --- single-step forward (module semantics: None -> implicit zeros) ---
    out0, st0 = mushroom_agent_forward(x, kparams, hidden_state=None)
    out1, st1 = mushroom_agent_forward(x, kparams, hidden_state=h0)
    jax.block_until_ready((out0, st0, out1, st1))

    r0 = ref_step_bf16(x, zeros_h, kparams)
    r1 = ref_step_bf16(x, h0, kparams)
    assert jnp.allclose(out0, r0[0], atol=1e-3), "fc3 (no state) mismatch"
    assert jnp.allclose(st0, r0[1], atol=1e-3), "state head (no state) mismatch"
    assert jnp.allclose(out1, r1[0], atol=1e-3), "fc3 (with state) mismatch"
    assert jnp.allclose(st1, r1[1], atol=1e-3), "state head (with state) mismatch"

    # Loose check vs. the pure-f32 PyTorch-equivalent reference
    # (difference is bf16 weight/activation rounding at the MXU inputs).
    f1 = ref_step_f32(x, h0, params)
    assert jnp.allclose(out1, f1[0], atol=5e-2, rtol=5e-2), "f32-ref fc3 mismatch"
    assert jnp.allclose(st1, f1[1], atol=5e-2, rtol=5e-2), "f32-ref state mismatch"

    # --- recurrent rollout: T steps fused in one pallas_call ---
    fc3_seq, st_seq = mushroom_agent_rollout(xs, kparams, hidden_state=h0)
    jax.block_until_ready((fc3_seq, st_seq))

    # Reference rollout: python loop, state_decoder output fed back each step.
    h = h0
    for t in range(seq):
        r_fc3, r_st = ref_step_bf16(xs[t], h, kparams)
        assert jnp.allclose(fc3_seq[t], r_fc3, atol=2e-3, rtol=2e-3), \
            f"rollout fc3 mismatch at step {t}"
        assert jnp.allclose(st_seq[t], r_st, atol=2e-3, rtol=2e-3), \
            f"rollout state mismatch at step {t}"
        h = r_st

    # Consistency: fused rollout vs. chained single-step kernel calls.
    h = h0
    for t in range(seq):
        k_fc3, k_st = mushroom_agent_forward(xs[t], kparams, hidden_state=h)
        assert jnp.allclose(fc3_seq[t], k_fc3, atol=1e-3, rtol=1e-3), \
            f"rollout vs step kernel fc3 mismatch at step {t}"
        assert jnp.allclose(st_seq[t], k_st, atol=1e-3, rtol=1e-3), \
            f"rollout vs step kernel state mismatch at step {t}"
        h = k_st

    print("KERNEL_OK")
</pallas_src>

<mosaic_0001>
module attributes {stable_mosaic.version = 11 : i64} {
  func.func @_step_kernel_no_state(%arg0: memref<2x16xf32, #tpu.memory_space<vmem>>, %arg1: memref<16x32xbf16, #tpu.memory_space<vmem>>, %arg2: memref<1x32xf32, #tpu.memory_space<vmem>>, %arg3: memref<32x32xbf16, #tpu.memory_space<vmem>>, %arg4: memref<1x32xf32, #tpu.memory_space<vmem>>, %arg5: memref<32x128xbf16, #tpu.memory_space<vmem>>, %arg6: memref<1x128xf32, #tpu.memory_space<vmem>>, %arg7: memref<2x128xf32, #tpu.memory_space<vmem>>) attributes {dimension_semantics = [], scalar_prefetch = 0 : i64, scratch_operands = 0 : i64, tpu.core_type = #tpu.core_type<tc>} {
    %c0 = arith.constant 0 : index
    %c0_0 = arith.constant 0 : index
    %0 = vector.load %arg0[%c0, %c0_0] : memref<2x16xf32, #tpu.memory_space<vmem>>, vector<2x16xf32>
    %1 = arith.truncf %0 : vector<2x16xf32> to vector<2x16xbf16>
    %c0_1 = arith.constant 0 : index
    %c0_2 = arith.constant 0 : index
    %2 = vector.load %arg1[%c0_1, %c0_2] : memref<16x32xbf16, #tpu.memory_space<vmem>>, vector<16x32xbf16>
    %cst = arith.constant dense<0.000000e+00> : vector<2x32xf32>
    %3 = tpu.matmul %1, %2, %cst {dimension_numbers = #tpu.dot_dimension_numbers<[1], [0], [0], [1], [0, 0, 1, 1], [], []>} : vector<2x16xbf16>, vector<16x32xbf16>, vector<2x32xf32> -> vector<2x32xf32>
    %c0_3 = arith.constant 0 : index
    %c0_4 = arith.constant 0 : index
    %4 = vector.load %arg2[%c0_3, %c0_4] : memref<1x32xf32, #tpu.memory_space<vmem>>, vector<1x32xf32>
    %5 = vector.broadcast %4 : vector<1x32xf32> to vector<2x32xf32>
    %6 = arith.addf %3, %5 : vector<2x32xf32>
    %cst_5 = arith.constant 0.000000e+00 : f32
    %7 = vector.broadcast %cst_5 : f32 to vector<2x32xf32>
    %8 = arith.maximumf %6, %7 : vector<2x32xf32>
    %9 = arith.truncf %8 : vector<2x32xf32> to vector<2x32xbf16>
    %c0_6 = arith.constant 0 : index
    %c0_7 = arith.constant 0 : index
    %10 = vector.load %arg3[%c0_6, %c0_7] : memref<32x32xbf16, #tpu.memory_space<vmem>>, vector<32x32xbf16>
    %cst_8 = arith.constant dense<0.000000e+00> : vector<2x32xf32>
    %11 = tpu.matmul %9, %10, %cst_8 {dimension_numbers = #tpu.dot_dimension_numbers<[1], [0], [0], [1], [0, 0, 1, 1], [], []>} : vector<2x32xbf16>, vector<32x32xbf16>, vector<2x32xf32> -> vector<2x32xf32>
    %c0_9 = arith.constant 0 : index
    %c0_10 = arith.constant 0 : index
    %12 = vector.load %arg4[%c0_9, %c0_10] : memref<1x32xf32, #tpu.memory_space<vmem>>, vector<1x32xf32>
    %13 = vector.broadcast %12 : vector<1x32xf32> to vector<2x32xf32>
    %14 = arith.addf %11, %13 : vector<2x32xf32>
    %cst_11 = arith.constant 0.000000e+00 : f32
    %15 = vector.broadcast %cst_11 : f32 to vector<2x32xf32>
    %16 = arith.maximumf %14, %15 : vector<2x32xf32>
    %17 = arith.truncf %16 : vector<2x32xf32> to vector<2x32xbf16>
    %c0_12 = arith.constant 0 : index
    %c0_13 = arith.constant 0 : index
    %18 = vector.load %arg5[%c0_12, %c0_13] : memref<32x128xbf16, #tpu.memory_space<vmem>>, vector<32x128xbf16>
    %cst_14 = arith.constant dense<0.000000e+00> : vector<2x128xf32>
    %19 = tpu.matmul %17, %18, %cst_14 {dimension_numbers = #tpu.dot_dimension_numbers<[1], [0], [0], [1], [0, 0, 1, 1], [], []>} : vector<2x32xbf16>, vector<32x128xbf16>, vector<2x128xf32> -> vector<2x128xf32>
    %c0_15 = arith.constant 0 : index
    %c0_16 = arith.constant 0 : index
    %20 = vector.load %arg6[%c0_15, %c0_16] : memref<1x128xf32, #tpu.memory_space<vmem>>, vector<1x128xf32>
    %21 = vector.broadcast %20 : vector<1x128xf32> to vector<2x128xf32>
    %22 = arith.addf %19, %21 : vector<2x128xf32>
    %c0_17 = arith.constant 0 : index
    %c0_18 = arith.constant 0 : index
    %23 = vector.load %arg7[%c0_17, %c0_18] : memref<2x128xf32, #tpu.memory_space<vmem>>, vector<2x128xf32>
    tpu.vector_store %arg7[%c0_17, %c0_18], %22 {strides = array<i32>} : memref<2x128xf32, #tpu.memory_space<vmem>>, vector<2x128xf32>,
    return
  }
}

</mosaic_0001>

<bundles_post_ra>
// kernel: tpu_custom_call.1
= control target key start
LH: loop header
LB: loop body
LE: loop exit
PB: predicated region body
PF: predicated region fallthrough
CT: control target
= control target key end

     0   :  { %12 = vsyncpa [#allocation3], 0  ;;  %s542_s0 = inlined_call_operand.hbm [shape: f32[2,16], index: 0, kind: input, shape index: {}]   ;;  %s543_s1 = inlined_call_operand.hbm [shape: bf16[16,32], index: 1, kind: input, shape index: {}]   ;;  %s544_s2 = inlined_call_operand.vmem [shape: f32[1,32], index: 2, kind: input, shape index: {}]   ;;  %s545_s3 = inlined_call_operand.hbm [shape: bf16[32,32], index: 3, kind: input, shape index: {}]   ;;  %s546_s4 = inlined_call_operand.vmem [shape: f32[1,32], index: 4, kind: input, shape index: {}]   ;;  %s547_s5 = inlined_call_operand.hbm [shape: bf16[32,128], index: 5, kind: input, shape index: {}]   ;;  %s548_s6 = inlined_call_operand.vmem [shape: f32[1,128], index: 6, kind: input, shape index: {}]   ;;  %s549_s7 = inlined_call_operand.hbm [shape: f32[2,128], index: 7, kind: output, shape index: {}]  }
   0x1   :  { %13 = vsyncpa [#allocation6], 0 }
   0x2   :  { %14 = vsyncpa [#allocation9], 0 }
   0x3   :  { %15 = vsyncpa [#allocation4], 0  ;;  %s460_s24 = smov [#allocation5]  }
   0x4   :  { %s31_s25 = sshll.u32 %s460_s24, 4  ;;  %s32_s25 = int_to_ptr.vmem [resolvable:$true] %s31_s25 }
   0x5   :  { %s360_s26 = scalar_lea.vmem %s32_s25, 128  ;;  %p365_p1 = scmp.lt.s32.totalorder %s32_s25, %s32_s25 }
   0x6   :  { %p361_p0 = scmp.ne.s32.totalorder %s32_s25, %s360_s26  ;;  %p366_p2 = scmp.lt.s32.totalorder %s360_s26, %s360_s26 }
   0x8   :  { %p367_p3 = por %p366_p2, %p365_p1 }
   0xa   :  { %p368_p4 = pnand %p367_p3, %p361_p0 }
   0xc   :  { %371 = shalt.err (!%p368_p4)
}
   0xd   :  { %s461_s27 = smov 64   ;;  %s462_s28 = smov 4  }
   0xe   :  { %37 = dma.hbm_to_vmem [thread:$0]  %s543_s1, 128, %s32_s25, [#allocation6], %s461_s27, %s461_s27, %s462_s28  }
   0xf   :  { %s463_s8 = smov [#allocation2]   ;;  %s464_s10 = smov [#allocation7]  }
  0x10   :  { %s22_s9 = sshll.u32 %s463_s8, 4  ;;  %s45_s11 = sshll.u32 %s464_s10, 4  ;;  %s23_s9 = int_to_ptr.vmem [resolvable:$true] %s22_s9  ;;  %s46_s11 = int_to_ptr.vmem [resolvable:$true] %s45_s11 }
  0x11   :  { %s380_s12 = scalar_lea.vmem %s23_s9, 32  ;;  %p385_p6 = scmp.lt.s32.totalorder %s23_s9, %s23_s9 }
  0x12   :  { %p381_p5 = scmp.ne.s32.totalorder %s23_s9, %s380_s12  ;;  %p386_p7 = scmp.lt.s32.totalorder %s380_s12, %s380_s12 }
  0x14   :  { %p387_p8 = por %p386_p7, %p385_p6 }
  0x16   :  { %p388_p9 = pnand %p387_p8, %p381_p5 }
  0x18   :  { %391 = shalt.err (!%p388_p9)
}
  0x19   :  { %25 = dma.hbm_to_vmem [thread:$0]  %s542_s0, 32, %s23_s9, [#allocation3]  }
  0x1a   :  { %s400_s15 = scalar_lea.vmem %s46_s11, 256  ;;  %p405_p11 = scmp.lt.s32.totalorder %s46_s11, %s46_s11 }
  0x1b   :  { %p401_p10 = scmp.ne.s32.totalorder %s46_s11, %s400_s15  ;;  %p406_p12 = scmp.lt.s32.totalorder %s400_s15, %s400_s15 }
  0x1d   :  { %p407_p13 = por %p406_p12, %p405_p11 }
  0x1f   :  { %p408_p0 = pnand %p407_p13, %p401_p10 }
  0x21   :  { %411 = shalt.err (!%p408_p0)
}
  0x22   :  { %51 = dma.hbm_to_vmem [thread:$0]  %s545_s3, 256, %s46_s11, [#allocation6], %s461_s27, %s461_s27, %s462_s28  }
  0x23   :  { %s465_s17 = smov [#allocation8]  }
  0x24   :  { %s59_s18 = sshll.u32 %s465_s17, 4  ;;  %s60_s18 = int_to_ptr.vmem [resolvable:$true] %s59_s18 }
  0x25   :  { %s420_s19 = scalar_lea.vmem %s60_s18, 256  ;;  %p425_p2 = scmp.lt.s32.totalorder %s60_s18, %s60_s18 }
  0x26   :  { %p421_p1 = scmp.ne.s32.totalorder %s60_s18, %s420_s19  ;;  %p426_p3 = scmp.lt.s32.totalorder %s420_s19, %s420_s19 }
  0x28   :  { %p427_p4 = por %p426_p3, %p425_p2 }
  0x2a   :  { %p428_p5 = pnand %p427_p4, %p421_p1 }
  0x2c   :  { %431 = shalt.err (!%p428_p5)
}
  0x2d   :  { %65 = dma.hbm_to_vmem [thread:$0]  %s547_s5, 256, %s60_s18, [#allocation9], %s461_s27, %s461_s27, %s462_s28  }
  0x2e   :  { %452 = dma.done.wait [#allocation3], 32  }
  0x2f   :  { %453 = vsyncadd [#allocation3], 4294967264 }
  0x30   :  { %454 = dma.done.wait [#allocation6], 384  }
  0x31   :  { %455 = vsyncadd [#allocation6], 4294966912 }
  0x32   :  { %456 = dma.done.wait [#allocation9], 256  }
  0x33   :  { %457 = vsyncadd [#allocation9], 4294967040  ;;  %v466_v0 = vmov 0.0   ;;  %vm467_vm0 = vmmov 0   ;;  %v347_v1 = vld [vmem:[#allocation5] sm:$0xff]   ;;  %vm98_vm1 = vcmask 130048  }
  0x34   :  { %316 = vmatprep.subr.bf16.mxu0 %v466_v0  ;;  %318 = vmatprep.mubr.msk.bf16.mxu0 %vm467_vm0, %v466_v0  ;;  %v81_v2 = vld [vmem:[#allocation2] sm:$0x3]  ;;  %v348_v4 = vld [vmem:[#allocation7 + $0x8] sm:$0xff]   ;;  %v349_v5 = vld [vmem:[#allocation7] sm:$0xff]   ;;  %vm167_vm2 = vcmask 261120   ;;  %s468_s24 = smov [#allocation10]  }
  0x35   :  { %322 = vmatprep.subr.bf16.mxu1 %v466_v0  ;;  %326 = vmatprep.mubr.msk.bf16.mxu1 %vm467_vm0, %v466_v0  ;;  %v82_v3 = vpack.c.bf16 %v81_v2, %v81_v2  ;;  %v350_v6 = vld [vmem:[#allocation8 + $0x8] sm:$0xff]   ;;  %v297_v7 = vld [vmem:[%s544_s2] ss:$0 sm:$0xff]  ;;  %s286_s25 = sshll.u32 %s468_s24, 4  ;;  %s287_s25 = int_to_ptr.vmem [resolvable:$true] %s286_s25 }
  0x36   :  { %317 = vmatpush3.bf16.msra.mxu0 %v347_v1  ;;  %323 = vmatpush3.bf16.msra.mxu1 %v348_v4  ;;  %v351_v15 = vld [vmem:[#allocation8] sm:$0xff]   ;;  %p437_p7 = scmp.lt.s32.totalorder %s287_s25, %s287_s25 }
  0x37   :  { %330 = vmatprep.subr.bf16.mxu0 %v466_v0  ;;  %324 = vmatprep.subr.bf16.mxu1 %v466_v0  ;;  %v300_v16 = vld [vmem:[%s546_s4] ss:$0 sm:$0xff]  ;;  %s432_s4 = scalar_lea.vmem %s287_s25, 32 }
  0x38   :  { %v304_v24 = vld [vmem:[%s548_s6] ss:$0 sm:$0xff]  ;;  %p433_p6 = scmp.ne.s32.totalorder %s287_s25, %s432_s4  ;;  %p438_p8 = scmp.lt.s32.totalorder %s432_s4, %s432_s4 }
  0x39   :  { %319 = vmatmul.mubr.msk.bf16.vlgmr.msra.gmra.mxu0 %vm98_vm1, %v82_v3 }
  0x3a   :  { %334 = vmatprep.mubr.msk.bf16.mxu0 %vm467_vm0, %v466_v0  ;;  %325 = vmatpush3.bf16.msra.mxu1 %v349_v5  ;;  %p439_p9 = por %p438_p8, %p437_p7 }
  0x3b   :  { %331 = vmatpush3.bf16.msra.mxu0 %v350_v6 }
  0x3c   :  { %332 = vmatprep.subr.bf16.mxu0 %v466_v0  ;;  %p440_p10 = pnand %p439_p9, %p433_p6 }
  0x3f   :  { %333 = vmatpush3.bf16.msra.mxu0 %v351_v15 }
  0xf9   :  { %v136_v8 = vpop.f32.mrf.mxu0 }
  0xfa   :  { %v137_v9 = vadd.f32 %v297_v7, %v136_v8 }
  0xfb   :  { %v320_v10 = vpop.f32.mrf.mxu0 }
  0xfc   :  { %v142_v11 = vmax.f32 %v137_v9, 0.0 }
  0xfd   :  { %v139_v12 = vpop.f32.mrf.mxu0 }
  0xfe   :  { %v143_v13 = vpack.c.bf16 %v142_v11, %v142_v11 }
  0xff   :  { %v321_v14 = vpop.f32.mrf.mxu0 }
 0x100   :  { %327 = vmatmul.mubr.msk.bf16.vlgmr.msra.gmra.mxu1 %vm167_vm2, %v143_v13 }
 0x1c0   :  { %v205_v17 = vpop.f32.mrf.mxu1 }
 0x1c1   :  { %v206_v18 = vadd.f32 %v300_v16, %v205_v17 }
 0x1c2   :  { %v328_v19 = vpop.f32.mrf.mxu1 }
 0x1c3   :  { %v211_v20 = vmax.f32 %v206_v18, 0.0 }
 0x1c4   :  { %v208_v21 = vpop.f32.mrf.mxu1 }
 0x1c5   :  { %v212_v22 = vpack.c.bf16 %v211_v20, %v211_v20 }
 0x1c6   :  { %v329_v23 = vpop.f32.mrf.mxu1 }
 0x1c7   :  { %335 = vmatmul.mubr.msk.bf16.vlgmr.msra.gmra.mxu0 %vm167_vm2, %v212_v22 }
 0x287   :  { %v273_v25 = vpop.f32.mrf.mxu0 }
 0x288   :  { %v274_v26 = vadd.f32 %v304_v24, %v273_v25 }
 0x289   :  { %v336_v27 = vpop.f32.mrf.mxu0 }
 0x28a   :  { %279 = vst [vmem:[#allocation10] sm:$0x3] %v274_v26 }
 0x28b   :  { %v276_v28 = vpop.f32.mrf.mxu0 }
 0x28c   :  { %443 = shalt.err (!%p440_p10)
}
 0x28d   :  { %289 = dma.vmem_to_hbm [thread:$0]  %s287_s25, 32, %s549_s7, [#allocation4]   ;;  %v337_v29 = vpop.f32.mrf.mxu0 }
 0x28e   :  { %458 = dma.done.wait [#allocation4], 32  }
 0x28f   :  { %459 = vsyncadd [#allocation4], 4294967264 }
 0x290   :  { %293 = vsyncpa [#allocation3], 1 }
 0x291   :  { %294 = vsyncpa [#allocation6], 1 }
 0x292   :  { %295 = vsyncpa [#allocation9], 1 }
 0x293   :  { %296 = vsyncpa [#allocation4], 1 }

</bundles_post_ra>
